<compile_context>
chip_gen: v7x
topology: tpu7x:2x2x1
jax: 0.10.0
libtpu: 0.0.40
codegen_flags: <defaults>
</compile_context>

<pallas_src>
import numpy as np
import jax
import jax.numpy as jnp
from jax.experimental import pallas as pl
from jax.experimental.pallas import tpu as pltpu

_LANES = 128            # input features per block row (lane dim of the input tile)
_MAX_BLOCK_ROWS = 1024  # row tile: output block = (1024, 128*B) f32 (~2 MiB for B=4)


def _round_up(v: int, m: int) -> int:
    return ((v + m - 1) // m) * m


def _make_stretch_matrix(C: int, B: int) -> jax.Array:
    """(C, C*B) matrix with S[i, i*B + j] = 2**-(B-1-j), else 0.

    dot(v, S) equals v repeated B times along lanes, pre-scaled so that
    floor(.) mod 2 yields bit (B-1-j) of v (MSB-first low-B bits).  Every entry,
    product and (single-nonzero-term) sum is exact for integer v in [0, 255],
    even in bf16 with f32 accumulation.
    """
    i = np.arange(C)[:, None]                 # (C, 1)
    l = np.arange(C * B)[None, :]             # (1, C*B)
    sel = ((l // B) == i).astype(np.float64)  # selection
    scale = 2.0 ** (-(B - 1 - (l % B)))       # per-lane power-of-two scale
    return jnp.asarray(sel * scale, dtype=jnp.bfloat16)


def _quant_bits_kernel(x_ref, s_ref, o_ref):
    """round -> wrap to uint8 -> emit low B bits MSB-first, lane-interleaved."""
    x = x_ref[...]                                   # (br, C) f32
    r = jnp.round(x)                                 # half-to-even == torch.round
    v = jnp.bitwise_and(r.astype(jnp.int32), 255)    # uint8 two's-complement wrap (cheap AND)
    vb = v.astype(jnp.float32).astype(jnp.bfloat16)  # exact for 0..255
    # Lane-dense "stretch + shift" on the MXU: w[r, i*B + j] = v[r, i] * 2**-(B-1-j)
    w = jnp.dot(vb, s_ref[...], preferred_element_type=jnp.float32)  # (br, C*B)
    t = jnp.floor(w)                                 # == v >> (B-1-j), as float
    o_ref[...] = t - 2.0 * jnp.floor(t * 0.5)        # t mod 2  -> {0.0, 1.0}


def quantization_layer(x: jax.Array, B: int) -> jax.Array:
    """Forward of QuantizationLayer: (batch, N) float -> (batch, N*B) float32 of {0,1}."""
    # TODO(synk): for tiny inputs (batch*N < ~10K) a plain jnp path beats the
    # pallas_call launch overhead; kept on the kernel path here so it is exercised.
    batch, n = x.shape
    if x.dtype != jnp.float32:
        x = x.astype(jnp.float32)

    C = _LANES
    T = batch * n
    R = -(-T // C)                               # rows needed
    br = min(_MAX_BLOCK_ROWS, _round_up(R, 8))   # sublane-dense row tile
    r_pad = _round_up(R, br)
    pad = r_pad * C - T

    xf = x.reshape(-1)
    if pad:
        xf = jnp.pad(xf, (0, pad))               # only hit when T isn't tile-aligned
    x2 = xf.reshape(r_pad, C)
    s = _make_stretch_matrix(C, B)

    grid = (r_pad // br,)
    out2 = pl.pallas_call(
        _quant_bits_kernel,
        out_shape=jax.ShapeDtypeStruct((r_pad, C * B), jnp.float32),
        grid_spec=pltpu.PrefetchScalarGridSpec(
            num_scalar_prefetch=0,
            grid=grid,
            in_specs=[
                pl.BlockSpec((br, C), lambda i: (i, 0)),
                pl.BlockSpec((C, C * B), lambda i: (0, 0)),  # constant block, fetched once
            ],
            out_specs=pl.BlockSpec((br, C * B), lambda i: (i, 0)),
        ),
        compiler_params=pltpu.CompilerParams(
            dimension_semantics=("parallel",),      # lets v7x shard rows over both TCs
            vmem_limit_bytes=32 * 1024 * 1024,      # fits v5e/v6e/v7x with headroom
        ),
    )(x2, s)

    out_flat = out2.reshape(-1)
    if pad:
        out_flat = out_flat[: T * B]
    return out_flat.reshape(batch, n * B)


def _reference(x: np.ndarray, B: int) -> np.ndarray:
    """Pure-numpy replica of Quantization.forward / Num2Bit for verification."""
    r = np.round(x)
    v = np.mod(r.astype(np.int64), 256).astype(np.uint8)
    batch, n = v.shape
    num_bits = 2 * B
    shifts = np.arange(num_bits - 1, -1, -1)                 # MSB -> LSB over 2B bits
    bits = (v[:, :, None].astype(np.int64) >> shifts[None, None, :]) & 1
    bits = bits[:, :, B:].reshape(batch, n * B)
    return bits.astype(np.float32)


if __name__ == "__main__":
    B = 4
    batch, n = 2, 16

    key = jax.random.PRNGKey(0)
    # Values in the natural quantizer range [0, 2**B - 1].
    x = jax.random.uniform(key, (batch, n), dtype=jnp.float32,
                           minval=0.0, maxval=float(2 ** B - 1))

    out = quantization_layer(x, B)
    out = jax.block_until_ready(out)

    ref = _reference(np.asarray(x), B)
    np.testing.assert_allclose(np.asarray(out), ref, rtol=0, atol=0)
    assert out.shape == (batch, n * B) and out.dtype == jnp.float32

    print("KERNEL_OK")
</pallas_src>

<mosaic_0001>
module attributes {stable_mosaic.version = 11 : i64} {
  func.func @_quant_bits_kernel(%arg0: i32, %arg1: memref<8x128xf32, #tpu.memory_space<vmem>>, %arg2: memref<128x512xbf16, #tpu.memory_space<vmem>>, %arg3: memref<8x512xf32, #tpu.memory_space<vmem>>) attributes {dimension_semantics = [#tpu.dimension_semantics<parallel>], iteration_bounds = array<i64: 1>, scalar_prefetch = 0 : i64, scratch_operands = 0 : i64, tpu.core_type = #tpu.core_type<tc>, window_params = [{transform_indices = @transform_0, window_bounds = array<i64: 8, 128>}, {pipeline_mode = #tpu.pipeline_mode<synchronous>, transform_indices = @transform_1, window_bounds = array<i64: 128, 512>}, {transform_indices = @transform_2, window_bounds = array<i64: 8, 512>}]} {
    %c0 = arith.constant 0 : index
    %c0_0 = arith.constant 0 : index
    %0 = vector.load %arg1[%c0, %c0_0] : memref<8x128xf32, #tpu.memory_space<vmem>>, vector<8x128xf32>
    %1 = math.roundeven %0 : vector<8x128xf32>
    %2 = arith.fptosi %1 : vector<8x128xf32> to vector<8x128xi32>
    %c255_i32 = arith.constant 255 : i32
    %3 = vector.broadcast %c255_i32 : i32 to vector<8x128xi32>
    %4 = arith.andi %2, %3 : vector<8x128xi32>
    %5 = arith.sitofp %4 : vector<8x128xi32> to vector<8x128xf32>
    %6 = arith.truncf %5 : vector<8x128xf32> to vector<8x128xbf16>
    %c0_1 = arith.constant 0 : index
    %c0_2 = arith.constant 0 : index
    %7 = vector.load %arg2[%c0_1, %c0_2] : memref<128x512xbf16, #tpu.memory_space<vmem>>, vector<128x512xbf16>
    %cst = arith.constant dense<0.000000e+00> : vector<8x512xf32>
    %8 = tpu.matmul %6, %7, %cst {dimension_numbers = #tpu.dot_dimension_numbers<[1], [0], [0], [1], [0, 0, 1, 1], [], []>} : vector<8x128xbf16>, vector<128x512xbf16>, vector<8x512xf32> -> vector<8x512xf32>
    %9 = math.floor %8 : vector<8x512xf32>
    %cst_3 = arith.constant 5.000000e-01 : f32
    %10 = vector.broadcast %cst_3 : f32 to vector<8x512xf32>
    %11 = arith.mulf %9, %10 : vector<8x512xf32>
    %12 = math.floor %11 : vector<8x512xf32>
    %cst_4 = arith.constant 2.000000e+00 : f32
    %13 = vector.broadcast %cst_4 : f32 to vector<8x512xf32>
    %14 = arith.mulf %13, %12 : vector<8x512xf32>
    %15 = arith.subf %9, %14 : vector<8x512xf32>
    %c0_5 = arith.constant 0 : index
    %c0_6 = arith.constant 0 : index
    %16 = vector.load %arg3[%c0_5, %c0_6] : memref<8x512xf32, #tpu.memory_space<vmem>>, vector<8x512xf32>
    tpu.vector_store %arg3[%c0_5, %c0_6], %15 {strides = array<i32>} : memref<8x512xf32, #tpu.memory_space<vmem>>, vector<8x512xf32>,
    return
  }
  func.func @transform_0(%arg0: i32) -> (i32, i32) {
    %c0_i32 = arith.constant 0 : i32
    %c0_i32_0 = arith.constant 0 : i32
    return %arg0, %c0_i32 : i32, i32
  }
  func.func @transform_1(%arg0: i32) -> (i32, i32) {
    %c0_i32 = arith.constant 0 : i32
    %c0_i32_0 = arith.constant 0 : i32
    %c0_i32_1 = arith.constant 0 : i32
    return %c0_i32, %c0_i32_0 : i32, i32
  }
  func.func @transform_2(%arg0: i32) -> (i32, i32) {
    %c0_i32 = arith.constant 0 : i32
    %c0_i32_0 = arith.constant 0 : i32
    return %arg0, %c0_i32 : i32, i32
  }
}

</mosaic_0001>

<bundles_post_ra>
// kernel: tpu_custom_call.1
= control target key start
LH: loop header
LB: loop body
LE: loop exit
PB: predicated region body
PF: predicated region fallthrough
CT: control target
= control target key end

     0   :  { %7 = vsyncpa [#allocation3], 0  ;;  %s583_s0 = inlined_call_operand.hbm [shape: f32[8,128], index: 0, kind: input, shape index: {}]   ;;  %s584_s1 = inlined_call_operand.hbm [shape: bf16[128,512], index: 1, kind: input, shape index: {}]   ;;  %s585_s2 = inlined_call_operand.hbm [shape: f32[8,512], index: 2, kind: output, shape index: {}]  }
   0x1   :  { %8 = vsyncpa [#allocation6], 0 }
   0x2   :  { %9 = vsyncpa [#allocation4], 0  ;;  %s519_s9 = smov [#allocation2]   ;;  %s520_s11 = smov [#allocation5]  }
   0x3   :  { %s16_s10 = sshll.u32 %s519_s9, 4  ;;  %s25_s12 = sshll.u32 %s520_s11, 4  ;;  %s17_s10 = int_to_ptr.vmem [resolvable:$true] %s16_s10  ;;  %s540_s12 = int_to_ptr.vmem [resolvable:$true] %s25_s12 }
   0x4   :  { %s447_s15 = scalar_lea.hbm %s583_s0, 128 }
   0x5   :  { %p448_p0 = scmp.ne.s32.totalorder %s583_s0, %s447_s15  ;;  %p451_p1 = scmp.lt.u32.totalorder %s447_s15, %s583_s0 }
   0x7   :  { %p453_p2 = pnand %p451_p1, %p448_p0 }
   0x9   :  { %456 = shalt.err (!%p453_p2)
}
   0xa   :  { %s457_s20 = scalar_lea.vmem %s17_s10, 128  ;;  %p462_p4 = scmp.lt.s32.totalorder %s17_s10, %s17_s10 }
   0xb   :  { %p458_p3 = scmp.ne.s32.totalorder %s17_s10, %s457_s20  ;;  %p463_p5 = scmp.lt.s32.totalorder %s457_s20, %s457_s20 }
   0xd   :  { %p464_p6 = por %p463_p5, %p462_p4 }
   0xf   :  { %p465_p7 = pnand %p464_p6, %p458_p3 }
  0x11   :  { %468 = shalt.err (!%p465_p7)
}
  0x12   :  { %19 = dma.hbm_to_vmem [thread:$0]  %s583_s0, 128, %s17_s10, [#allocation3]  }
  0x13   :  { %s469_s25 = scalar_lea.hbm %s584_s1, 4096 }
  0x14   :  { %p470_p8 = scmp.ne.s32.totalorder %s584_s1, %s469_s25  ;;  %p473_p9 = scmp.lt.u32.totalorder %s469_s25, %s584_s1 }
  0x16   :  { %p475_p10 = pnand %p473_p9, %p470_p8 }
  0x18   :  { %478 = shalt.err (!%p475_p10)
}
  0x19   :  { %s479_s30 = scalar_lea.vmem %s540_s12, 4096  ;;  %p484_p12 = scmp.lt.s32.totalorder %s540_s12, %s540_s12 }
  0x1a   :  { %p480_p11 = scmp.ne.s32.totalorder %s540_s12, %s479_s30  ;;  %p485_p13 = scmp.lt.s32.totalorder %s479_s30, %s479_s30 }
  0x1c   :  { %p486_p0 = por %p485_p13, %p484_p12 }
  0x1e   :  { %p487_p1 = pnand %p486_p0, %p480_p11 }
  0x20   :  { %490 = shalt.err (!%p487_p1)
}
  0x21   :  { %s521_s0 = smov 256   ;;  %s522_s3 = smov 16  }
  0x22   :  { %31 = dma.hbm_to_vmem [thread:$0]  %s584_s1, 4096, %s540_s12, [#allocation6], %s521_s0, %s521_s0, %s522_s3  }
  0x23   :  { %513 = dma.done.wait [#allocation3], 128  }
  0x24   :  { %514 = vsyncadd [#allocation3], 4294967168 }
  0x25   :  { %515 = dma.done.wait [#allocation6], 4096  }
  0x26   :  { %516 = vsyncadd [#allocation6], 4294963200  ;;  %v523_v0 = vmov 0   ;;  %v399_v1 = vld [vmem:[#allocation5 + $0x4] ss:$16 sps:$4 sm:$0xff]   ;;  %v39_v27 = vld [vmem:[#allocation2] sm:$0xff] }
  0x27   :  { %268 = vmatprep.mubr.bf16.mxu0 %v523_v0  ;;  %309 = vmatprep.mubr.bf16.mxu1 %v523_v0  ;;  %v401_v2 = vld [vmem:[#allocation5 + $0xc] ss:$16 sps:$4 sm:$0xff]   ;;  %v403_v3 = vld [vmem:[#allocation5] ss:$16 sps:$4 sm:$0xff]   ;;  %v404_v4 = vld [vmem:[#allocation5 + $0x8] ss:$16 sps:$4 sm:$0xff]   ;;  %v392_v28 = vcvt.f32.s32 %v39_v27 }
  0x28   :  { %236 = vmatprep.subr.bf16.mxu0 %v399_v1  ;;  %277 = vmatprep.subr.bf16.mxu1 %v401_v2  ;;  %v405_v5 = vld [vmem:[#allocation5 + $0x24] ss:$16 sps:$4 sm:$0xff]   ;;  %v407_v6 = vld [vmem:[#allocation5 + $0x2c] ss:$16 sps:$4 sm:$0xff]   ;;  %v409_v7 = vld [vmem:[#allocation5 + $0x20] ss:$16 sps:$4 sm:$0xff]  }
  0x29   :  { %237 = vmatpush1.bf16.msra.mxu0 %v403_v3  ;;  %278 = vmatpush1.bf16.msra.mxu1 %v404_v4  ;;  %v410_v8 = vld [vmem:[#allocation5 + $0x28] ss:$16 sps:$4 sm:$0xff]   ;;  %v411_v9 = vld [vmem:[#allocation5 + $0x44] ss:$16 sps:$4 sm:$0xff]   ;;  %v413_v10 = vld [vmem:[#allocation5 + $0x4c] ss:$16 sps:$4 sm:$0xff]  }
  0x2a   :  { %238 = vmatprep.subr.bf16.mxu0 %v405_v5  ;;  %279 = vmatprep.subr.bf16.mxu1 %v407_v6  ;;  %v415_v11 = vld [vmem:[#allocation5 + $0x40] ss:$16 sps:$4 sm:$0xff]   ;;  %v416_v12 = vld [vmem:[#allocation5 + $0x48] ss:$16 sps:$4 sm:$0xff]   ;;  %v417_v13 = vld [vmem:[#allocation5 + $0x64] ss:$16 sps:$4 sm:$0xff]  }
  0x2b   :  { %v419_v14 = vld [vmem:[#allocation5 + $0x6c] ss:$16 sps:$4 sm:$0xff]   ;;  %v421_v15 = vld [vmem:[#allocation5 + $0x60] ss:$16 sps:$4 sm:$0xff]   ;;  %v422_v16 = vld [vmem:[#allocation5 + $0x68] ss:$16 sps:$4 sm:$0xff]  }
  0x2c   :  { %v423_v17 = vld [vmem:[#allocation5 + $0x84] ss:$16 sps:$4 sm:$0xff]   ;;  %v425_v18 = vld [vmem:[#allocation5 + $0x8c] ss:$16 sps:$4 sm:$0xff]   ;;  %v427_v19 = vld [vmem:[#allocation5 + $0x80] ss:$16 sps:$4 sm:$0xff]  }
  0x2d   :  { %239 = vmatpush1.bf16.msra.mxu0 %v409_v7  ;;  %280 = vmatpush1.bf16.msra.mxu1 %v410_v8  ;;  %v428_v20 = vld [vmem:[#allocation5 + $0x88] ss:$16 sps:$4 sm:$0xff]   ;;  %v429_v21 = vld [vmem:[#allocation5 + $0xa4] ss:$16 sps:$4 sm:$0xff]   ;;  %v431_v22 = vld [vmem:[#allocation5 + $0xac] ss:$16 sps:$4 sm:$0xff]  }
  0x2e   :  { %240 = vmatprep.subr.bf16.mxu0 %v411_v9  ;;  %281 = vmatprep.subr.bf16.mxu1 %v413_v10  ;;  %v433_v23 = vld [vmem:[#allocation5 + $0xa0] ss:$16 sps:$4 sm:$0xff]   ;;  %v434_v24 = vld [vmem:[#allocation5 + $0xa8] ss:$16 sps:$4 sm:$0xff]   ;;  %v435_v25 = vld [vmem:[#allocation5 + $0xc4] ss:$16 sps:$4 sm:$0xff]  }
  0x2f   :  { %v437_v26 = vld [vmem:[#allocation5 + $0xcc] ss:$16 sps:$4 sm:$0xff]   ;;  %v439_v29 = vld [vmem:[#allocation5 + $0xc0] ss:$16 sps:$4 sm:$0xff]   ;;  %v440_v30 = vld [vmem:[#allocation5 + $0xc8] ss:$16 sps:$4 sm:$0xff]  }
  0x30   :  { %v41_v31 = vand.u32 255, %v392_v28  ;;  %v441_v32 = vld [vmem:[#allocation5 + $0xe4] ss:$16 sps:$4 sm:$0xff]   ;;  %v443_v33 = vld [vmem:[#allocation5 + $0xec] ss:$16 sps:$4 sm:$0xff]   ;;  %s524_s1 = smov [#allocation7]  }
  0x31   :  { %241 = vmatpush1.bf16.msra.mxu0 %v415_v11  ;;  %282 = vmatpush1.bf16.msra.mxu1 %v416_v12  ;;  %v445_v35 = vld [vmem:[#allocation5 + $0xe0] ss:$16 sps:$4 sm:$0xff]   ;;  %v446_v36 = vld [vmem:[#allocation5 + $0xe8] ss:$16 sps:$4 sm:$0xff]   ;;  %s348_s6 = sshll.u32 %s524_s1, 4  ;;  %s349_s6 = int_to_ptr.vmem [resolvable:$true] %s348_s6 }
  0x32   :  { %242 = vmatprep.subr.bf16.mxu0 %v417_v13  ;;  %283 = vmatprep.subr.bf16.mxu1 %v419_v14  ;;  %v42_v34 = vcvt.s32.f32 %v41_v31  ;;  %s491_s7 = scalar_lea.vmem %s349_s6, 512  ;;  %p496_p3 = scmp.lt.s32.totalorder %s349_s6, %s349_s6 }
  0x33   :  { %p492_p2 = scmp.ne.s32.totalorder %s349_s6, %s491_s7  ;;  %p497_p4 = scmp.lt.s32.totalorder %s491_s7, %s491_s7 }
  0x34   :  { %v43_v37 = vpack.c.bf16 %v42_v34, %v42_v34 }
  0x35   :  { %243 = vmatpush1.bf16.msra.mxu0 %v421_v15  ;;  %284 = vmatpush1.bf16.msra.mxu1 %v422_v16  ;;  %p498_p5 = por %p497_p4, %p496_p3 }
  0x36   :  { %244 = vmatprep.subr.bf16.mxu0 %v423_v17  ;;  %285 = vmatprep.subr.bf16.mxu1 %v425_v18 }
  0x37   :  { %p499_p6 = pnand %p498_p5, %p492_p2 }
  0x39   :  { %245 = vmatpush1.bf16.msra.mxu0 %v427_v19  ;;  %286 = vmatpush1.bf16.msra.mxu1 %v428_v20 }
  0x3a   :  { %246 = vmatprep.subr.bf16.mxu0 %v429_v21  ;;  %287 = vmatprep.subr.bf16.mxu1 %v431_v22 }
  0x3d   :  { %247 = vmatpush1.bf16.msra.mxu0 %v433_v23  ;;  %288 = vmatpush1.bf16.msra.mxu1 %v434_v24 }
  0x3e   :  { %248 = vmatprep.subr.bf16.mxu0 %v435_v25  ;;  %289 = vmatprep.subr.bf16.mxu1 %v437_v26 }
  0x41   :  { %249 = vmatpush1.bf16.msra.mxu0 %v439_v29  ;;  %290 = vmatpush1.bf16.msra.mxu1 %v440_v30 }
  0x42   :  { %250 = vmatprep.subr.bf16.mxu0 %v441_v32  ;;  %291 = vmatprep.subr.bf16.mxu1 %v443_v33 }
  0x45   :  { %251 = vmatpush1.bf16.msra.mxu0 %v445_v35  ;;  %292 = vmatpush1.bf16.msra.mxu1 %v446_v36 }
  0x48   :  { %269 = vmatmul.mubr.bf16.vlgmr.msra.gmra.mrb[0].mxu0 %v43_v37  ;;  %310 = vmatmul.mubr.bf16.vlgmr.msra.gmra.mrb[0].mxu1 %v43_v37 }
 0x11b   :  { %v270_v38 = vpop.f32.mrb[0].mxu0  ;;  %v311_v39 = vpop.f32.mrb[0].mxu1 }
 0x11c   :  { %v318_v40 = vfloor.f32 %v270_v38  ;;  %v320_v41 = vfloor.f32 %v311_v39  ;;  %v272_v42 = vpop.f32.mrb[1].mxu0  ;;  %v313_v43 = vpop.f32.mrb[1].mxu1 }
 0x11d   :  { %v319_v44 = vfloor.f32 %v272_v42  ;;  %v321_v45 = vfloor.f32 %v313_v43  ;;  %v274_v46 = vpop.f32.mrb[2].mxu0  ;;  %v315_v47 = vpop.f32.mrb[2].mxu1 }
 0x11e   :  { %v322_v48 = vmul.f32 0.5, %v318_v40  ;;  %v324_v49 = vmul.f32 0.5, %v320_v41  ;;  %v275_v50 = vpop.f32.mrb[3].mxu0  ;;  %v316_v51 = vpop.f32.mrb[3].mxu1 }
 0x11f   :  { %v323_v52 = vmul.f32 0.5, %v319_v44  ;;  %v325_v53 = vmul.f32 0.5, %v321_v45 }
 0x120   :  { %v326_v54 = vfloor.f32 %v322_v48  ;;  %v328_v55 = vfloor.f32 %v324_v49 }
 0x121   :  { %v327_v56 = vfloor.f32 %v323_v52  ;;  %v329_v57 = vfloor.f32 %v325_v53 }
 0x122   :  { %v330_v58 = vmul.f32 2.0, %v326_v54  ;;  %v332_v59 = vmul.f32 2.0, %v328_v55 }
 0x123   :  { %v331_v60 = vmul.f32 2.0, %v327_v56  ;;  %v333_v61 = vmul.f32 2.0, %v329_v57 }
 0x124   :  { %v334_v62 = vsub.f32 %v318_v40, %v330_v58  ;;  %v336_v63 = vsub.f32 %v320_v41, %v332_v59 }
 0x125   :  { %v335_v0 = vsub.f32 %v319_v44, %v331_v60  ;;  %v337_v1 = vsub.f32 %v321_v45, %v333_v61 }
 0x126   :  { %338 = vst [vmem:[#allocation7] sm:$0xff] %v334_v62  ;;  %340 = vst [vmem:[#allocation7 + $0x10] sm:$0xff] %v336_v63 }
 0x127   :  { %339 = vst [vmem:[#allocation7 + $0x8] sm:$0xff] %v335_v0  ;;  %341 = vst [vmem:[#allocation7 + $0x18] sm:$0xff] %v337_v1 }
 0x128   :  { %502 = shalt.err (!%p499_p6)
}
 0x129   :  { %s503_s10 = scalar_lea.hbm %s585_s2, 512 }
 0x12a   :  { %p504_p7 = scmp.ne.s32.totalorder %s585_s2, %s503_s10  ;;  %p507_p8 = scmp.lt.u32.totalorder %s503_s10, %s585_s2 }
 0x12c   :  { %p509_p9 = pnand %p507_p8, %p504_p7 }
 0x12e   :  { %512 = shalt.err (!%p509_p9)
}
 0x12f   :  { %351 = dma.vmem_to_hbm [thread:$0]  %s349_s6, 512, %s585_s2, [#allocation4]  }
 0x130   :  { %517 = dma.done.wait [#allocation4], 512  }
 0x131   :  { %518 = vsyncadd [#allocation4], 4294966784 }
 0x132   :  { %355 = vsyncpa [#allocation3], 1 }
 0x133   :  { %356 = vsyncpa [#allocation6], 1 }
 0x134   :  { %357 = vsyncpa [#allocation4], 1 }

</bundles_post_ra>
